<compile_context>
chip_gen: v6e
topology: v6e:2x2x1
jax: 0.10.0
libtpu: 0.0.40
codegen_flags: <defaults>
</compile_context>

<pallas_src>
import jax
import jax.numpy as jnp
from jax.experimental import pallas as pl
from jax.experimental.pallas import tpu as pltpu

BN_EPS = 1e-5


def _bn_layer(y, gamma, beta, *, apply_relu):
    """BatchNorm1d (training mode, biased batch variance) + optional ReLU.

    y: (B, D) f32 pre-activation; gamma/beta: (1, D) f32.
    """
    mean = jnp.mean(y, axis=0, keepdims=True)
    centered = y - mean
    var = jnp.mean(centered * centered, axis=0, keepdims=True)
    scale = gamma * jax.lax.rsqrt(var + BN_EPS)      # folded affine
    out = centered * scale + beta                    # one FMA per element
    if apply_relu:
        out = jnp.maximum(out, 0.0)
    return out


def _projection_mlp_kernel(x_ref,
                           w1_ref, g1_ref, b1_ref,
                           w2_ref, g2_ref, b2_ref,
                           w3_ref, g3_ref, b3_ref,
                           o_ref):
    # Layer 1: bf16 MXU matmul, f32 accumulation.  Linear bias dropped (cancelled by BN).
    h = jnp.dot(x_ref[...], w1_ref[...], preferred_element_type=jnp.float32)
    h = _bn_layer(h, g1_ref[...], b1_ref[...], apply_relu=True)

    # Layer 2
    h = jnp.dot(h.astype(jnp.bfloat16), w2_ref[...],
                preferred_element_type=jnp.float32)
    h = _bn_layer(h, g2_ref[...], b2_ref[...], apply_relu=True)

    # Layer 3 (no ReLU)
    h = jnp.dot(h.astype(jnp.bfloat16), w3_ref[...],
                preferred_element_type=jnp.float32)
    h = _bn_layer(h, g3_ref[...], b3_ref[...], apply_relu=False)

    o_ref[...] = h.astype(o_ref.dtype)


def projection_mlp_pallas(x2d, params):
    """x2d: (B, Din) bf16; params: dict with bf16 weights and f32 gamma/beta."""
    B, Din = x2d.shape
    H = params["w1"].shape[1]
    Dout = params["w3"].shape[1]

    def full(shape):
        # Single full-array VMEM block (satisfies the (8,128) rule by equalling
        # the full array dims); index_map is constant since grid=(1,).
        return pl.BlockSpec(shape, lambda i: (0,) * len(shape))

    flops = 2 * B * (Din * H + H * H + H * Dout)
    transcendentals = 2 * H + Dout                       # one rsqrt per feature per BN
    bytes_accessed = (
        x2d.size * x2d.dtype.itemsize
        + sum(params[k].size * params[k].dtype.itemsize
              for k in ("w1", "g1", "be1", "w2", "g2", "be2", "w3", "g3", "be3"))
        + B * Dout * 4)

    return pl.pallas_call(
        _projection_mlp_kernel,
        out_shape=jax.ShapeDtypeStruct((B, Dout), jnp.float32),
        grid=(1,),
        in_specs=[
            full((B, Din)),
            full((Din, H)), full((1, H)), full((1, H)),
            full((H, H)),   full((1, H)), full((1, H)),
            full((H, Dout)), full((1, Dout)), full((1, Dout)),
        ],
        out_specs=full((B, Dout)),
        compiler_params=pltpu.CompilerParams(
            dimension_semantics=("arbitrary",)),
        cost_estimate=pl.CostEstimate(
            flops=flops,
            transcendentals=transcendentals,
            bytes_accessed=bytes_accessed),
    )(x2d,
      params["w1"], params["g1"], params["be1"],
      params["w2"], params["g2"], params["be2"],
      params["w3"], params["g3"], params["be3"])


def init_linear(key, in_dim, out_dim):
    # Deterministic PyTorch-style init: U(-1/sqrt(in), 1/sqrt(in)).
    kw, kb = jax.random.split(key)
    bound = 1.0 / jnp.sqrt(jnp.float32(in_dim))
    w = jax.random.uniform(kw, (in_dim, out_dim), jnp.float32, -bound, bound)
    b = jax.random.uniform(kb, (1, out_dim), jnp.float32, -bound, bound)
    return w, b


def init_bn(dim):
    # PyTorch BatchNorm1d default affine init: gamma=1, beta=0.
    return jnp.ones((1, dim), jnp.float32), jnp.zeros((1, dim), jnp.float32)


def make_params(key, in_dim, hidden_dim, out_dim):
    k1, k2, k3 = jax.random.split(key, 3)
    w1, b1 = init_linear(k1, in_dim, hidden_dim)
    w2, b2 = init_linear(k2, hidden_dim, hidden_dim)
    w3, b3 = init_linear(k3, hidden_dim, out_dim)
    g1, be1 = init_bn(hidden_dim)
    g2, be2 = init_bn(hidden_dim)
    g3, be3 = init_bn(out_dim)
    # Weights stored in bf16: halves HBM traffic and feeds the MXU's native bf16 path.
    # Biases are kept (f32) only for the reference; the kernel does not use them
    # because BN's batch-mean subtraction cancels them exactly.
    return dict(
        w1=w1.astype(jnp.bfloat16), b1=b1, g1=g1, be1=be1,
        w2=w2.astype(jnp.bfloat16), b2=b2, g2=g2, be2=be2,
        w3=w3.astype(jnp.bfloat16), b3=b3, g3=g3, be3=be3)


@jax.jit
def projection_mlp_forward(x, params):
    # torch.flatten(x, 1), then bf16 for the MXU matmuls (f32 accumulation in-kernel).
    B = x.shape[0]
    h = x.reshape(B, -1).astype(jnp.bfloat16)
    return projection_mlp_pallas(h, params)


def reference_forward(x, params):
    """PyTorch-semantics reference (Linear WITH bias, BN train-mode, ReLU).

    Matmul inputs are cast to bf16 to mirror the kernel's precision choice;
    accumulation is f32.
    """
    B = x.shape[0]
    h = x.reshape(B, -1).astype(jnp.float32)

    def layer(h, w, b, g, be, relu):
        y = jnp.dot(h.astype(jnp.bfloat16), w,
                    preferred_element_type=jnp.float32) + b
        mean = jnp.mean(y, axis=0, keepdims=True)
        var = jnp.mean((y - mean) ** 2, axis=0, keepdims=True)
        y = (y - mean) * jax.lax.rsqrt(var + BN_EPS) * g + be
        return jnp.maximum(y, 0.0) if relu else y

    h = layer(h, params["w1"], params["b1"], params["g1"], params["be1"], True)
    h = layer(h, params["w2"], params["b2"], params["g2"], params["be2"], True)
    h = layer(h, params["w3"], params["b3"], params["g3"], params["be3"], False)
    return h


if __name__ == "__main__":
    key = jax.random.PRNGKey(0)
    kx, kp = jax.random.split(key)

    # Small NCHW input: in_dim = 4*16*16 = 1024; hidden/out = 128 (lane-aligned).
    B, C, H, W = 8, 4, 16, 16
    in_dim = C * H * W
    hidden_dim = 128
    out_dim = 128

    x = jax.random.normal(kx, (B, C, H, W), jnp.float32)
    params = make_params(kp, in_dim, hidden_dim, out_dim)

    out = jax.block_until_ready(projection_mlp_forward(x, params))
    ref = reference_forward(x, params)

    assert out.shape == (B, out_dim)
    # bf16 matmul inputs -> slightly looser tolerance than pure-f32.
    assert jnp.allclose(out, ref, atol=2e-2, rtol=2e-2), "mismatch vs reference"

    print("KERNEL_OK")
</pallas_src>

<mosaic_0001>
module attributes {stable_mosaic.version = 11 : i64} {
  func.func @_projection_mlp_kernel(%arg0: i32, %arg1: memref<8x1024xbf16, #tpu.memory_space<vmem>>, %arg2: memref<1024x128xbf16, #tpu.memory_space<vmem>>, %arg3: memref<1x128xf32, #tpu.memory_space<vmem>>, %arg4: memref<1x128xf32, #tpu.memory_space<vmem>>, %arg5: memref<128x128xbf16, #tpu.memory_space<vmem>>, %arg6: memref<1x128xf32, #tpu.memory_space<vmem>>, %arg7: memref<1x128xf32, #tpu.memory_space<vmem>>, %arg8: memref<128x128xbf16, #tpu.memory_space<vmem>>, %arg9: memref<1x128xf32, #tpu.memory_space<vmem>>, %arg10: memref<1x128xf32, #tpu.memory_space<vmem>>, %arg11: memref<8x128xf32, #tpu.memory_space<vmem>>) attributes {dimension_semantics = [#tpu.dimension_semantics<arbitrary>], iteration_bounds = array<i64: 1>, scalar_prefetch = 0 : i64, scratch_operands = 0 : i64, tpu.core_type = #tpu.core_type<tc>, window_params = [{pipeline_mode = #tpu.pipeline_mode<synchronous>, transform_indices = @transform_0, window_bounds = array<i64: 8, 1024>}, {pipeline_mode = #tpu.pipeline_mode<synchronous>, transform_indices = @transform_1, window_bounds = array<i64: 1024, 128>}, {pipeline_mode = #tpu.pipeline_mode<synchronous>, transform_indices = @transform_2, window_bounds = array<i64: 1, 128>}, {pipeline_mode = #tpu.pipeline_mode<synchronous>, transform_indices = @transform_3, window_bounds = array<i64: 1, 128>}, {pipeline_mode = #tpu.pipeline_mode<synchronous>, transform_indices = @transform_4, window_bounds = array<i64: 128, 128>}, {pipeline_mode = #tpu.pipeline_mode<synchronous>, transform_indices = @transform_5, window_bounds = array<i64: 1, 128>}, {pipeline_mode = #tpu.pipeline_mode<synchronous>, transform_indices = @transform_6, window_bounds = array<i64: 1, 128>}, {pipeline_mode = #tpu.pipeline_mode<synchronous>, transform_indices = @transform_7, window_bounds = array<i64: 128, 128>}, {pipeline_mode = #tpu.pipeline_mode<synchronous>, transform_indices = @transform_8, window_bounds = array<i64: 1, 128>}, {pipeline_mode = #tpu.pipeline_mode<synchronous>, transform_indices = @transform_9, window_bounds = array<i64: 1, 128>}, {pipeline_mode = #tpu.pipeline_mode<synchronous>, transform_indices = @transform_10, window_bounds = array<i64: 8, 128>}]} {
    %c0 = arith.constant 0 : index
    %c0_0 = arith.constant 0 : index
    %0 = vector.load %arg1[%c0, %c0_0] : memref<8x1024xbf16, #tpu.memory_space<vmem>>, vector<8x1024xbf16>
    %c0_1 = arith.constant 0 : index
    %c0_2 = arith.constant 0 : index
    %1 = vector.load %arg2[%c0_1, %c0_2] : memref<1024x128xbf16, #tpu.memory_space<vmem>>, vector<1024x128xbf16>
    %cst = arith.constant dense<0.000000e+00> : vector<8x128xf32>
    %2 = tpu.matmul %0, %1, %cst {dimension_numbers = #tpu.dot_dimension_numbers<[1], [0], [0], [1], [0, 0, 1, 1], [], []>} : vector<8x1024xbf16>, vector<1024x128xbf16>, vector<8x128xf32> -> vector<8x128xf32>
    %c0_3 = arith.constant 0 : index
    %c0_4 = arith.constant 0 : index
    %3 = vector.load %arg3[%c0_3, %c0_4] : memref<1x128xf32, #tpu.memory_space<vmem>>, vector<1x128xf32>
    %c0_5 = arith.constant 0 : index
    %c0_6 = arith.constant 0 : index
    %4 = vector.load %arg4[%c0_5, %c0_6] : memref<1x128xf32, #tpu.memory_space<vmem>>, vector<1x128xf32>
    %cst_7 = arith.constant dense<0.000000e+00> : vector<128xf32>
    %5 = vector.multi_reduction <add>, %2, %cst_7 [0] : vector<8x128xf32> to vector<128xf32>
    %6 = vector.shape_cast %5 : vector<128xf32> to vector<1x128xf32>
    %cst_8 = arith.constant 8.000000e+00 : f32
    %7 = vector.broadcast %cst_8 : f32 to vector<1x128xf32>
    %8 = arith.divf %6, %7 : vector<1x128xf32>
    %9 = vector.broadcast %8 : vector<1x128xf32> to vector<8x128xf32>
    %10 = arith.subf %2, %9 : vector<8x128xf32>
    %11 = arith.mulf %10, %10 : vector<8x128xf32>
    %cst_9 = arith.constant dense<0.000000e+00> : vector<128xf32>
    %12 = vector.multi_reduction <add>, %11, %cst_9 [0] : vector<8x128xf32> to vector<128xf32>
    %13 = vector.shape_cast %12 : vector<128xf32> to vector<1x128xf32>
    %cst_10 = arith.constant 8.000000e+00 : f32
    %14 = vector.broadcast %cst_10 : f32 to vector<1x128xf32>
    %15 = arith.divf %13, %14 : vector<1x128xf32>
    %cst_11 = arith.constant 9.99999974E-6 : f32
    %16 = vector.broadcast %cst_11 : f32 to vector<1x128xf32>
    %17 = arith.addf %15, %16 : vector<1x128xf32>
    %18 = math.rsqrt %17 : vector<1x128xf32>
    %19 = arith.mulf %3, %18 : vector<1x128xf32>
    %20 = vector.broadcast %19 : vector<1x128xf32> to vector<8x128xf32>
    %21 = arith.mulf %10, %20 : vector<8x128xf32>
    %22 = vector.broadcast %4 : vector<1x128xf32> to vector<8x128xf32>
    %23 = arith.addf %21, %22 : vector<8x128xf32>
    %cst_12 = arith.constant 0.000000e+00 : f32
    %24 = vector.broadcast %cst_12 : f32 to vector<8x128xf32>
    %25 = arith.maximumf %23, %24 : vector<8x128xf32>
    %26 = arith.truncf %25 : vector<8x128xf32> to vector<8x128xbf16>
    %c0_13 = arith.constant 0 : index
    %c0_14 = arith.constant 0 : index
    %27 = vector.load %arg5[%c0_13, %c0_14] : memref<128x128xbf16, #tpu.memory_space<vmem>>, vector<128x128xbf16>
    %cst_15 = arith.constant dense<0.000000e+00> : vector<8x128xf32>
    %28 = tpu.matmul %26, %27, %cst_15 {dimension_numbers = #tpu.dot_dimension_numbers<[1], [0], [0], [1], [0, 0, 1, 1], [], []>} : vector<8x128xbf16>, vector<128x128xbf16>, vector<8x128xf32> -> vector<8x128xf32>
    %c0_16 = arith.constant 0 : index
    %c0_17 = arith.constant 0 : index
    %29 = vector.load %arg6[%c0_16, %c0_17] : memref<1x128xf32, #tpu.memory_space<vmem>>, vector<1x128xf32>
    %c0_18 = arith.constant 0 : index
    %c0_19 = arith.constant 0 : index
    %30 = vector.load %arg7[%c0_18, %c0_19] : memref<1x128xf32, #tpu.memory_space<vmem>>, vector<1x128xf32>
    %cst_20 = arith.constant dense<0.000000e+00> : vector<128xf32>
    %31 = vector.multi_reduction <add>, %28, %cst_20 [0] : vector<8x128xf32> to vector<128xf32>
    %32 = vector.shape_cast %31 : vector<128xf32> to vector<1x128xf32>
    %cst_21 = arith.constant 8.000000e+00 : f32
    %33 = vector.broadcast %cst_21 : f32 to vector<1x128xf32>
    %34 = arith.divf %32, %33 : vector<1x128xf32>
    %35 = vector.broadcast %34 : vector<1x128xf32> to vector<8x128xf32>
    %36 = arith.subf %28, %35 : vector<8x128xf32>
    %37 = arith.mulf %36, %36 : vector<8x128xf32>
    %cst_22 = arith.constant dense<0.000000e+00> : vector<128xf32>
    %38 = vector.multi_reduction <add>, %37, %cst_22 [0] : vector<8x128xf32> to vector<128xf32>
    %39 = vector.shape_cast %38 : vector<128xf32> to vector<1x128xf32>
    %cst_23 = arith.constant 8.000000e+00 : f32
    %40 = vector.broadcast %cst_23 : f32 to vector<1x128xf32>
    %41 = arith.divf %39, %40 : vector<1x128xf32>
    %cst_24 = arith.constant 9.99999974E-6 : f32
    %42 = vector.broadcast %cst_24 : f32 to vector<1x128xf32>
    %43 = arith.addf %41, %42 : vector<1x128xf32>
    %44 = math.rsqrt %43 : vector<1x128xf32>
    %45 = arith.mulf %29, %44 : vector<1x128xf32>
    %46 = vector.broadcast %45 : vector<1x128xf32> to vector<8x128xf32>
    %47 = arith.mulf %36, %46 : vector<8x128xf32>
    %48 = vector.broadcast %30 : vector<1x128xf32> to vector<8x128xf32>
    %49 = arith.addf %47, %48 : vector<8x128xf32>
    %cst_25 = arith.constant 0.000000e+00 : f32
    %50 = vector.broadcast %cst_25 : f32 to vector<8x128xf32>
    %51 = arith.maximumf %49, %50 : vector<8x128xf32>
    %52 = arith.truncf %51 : vector<8x128xf32> to vector<8x128xbf16>
    %c0_26 = arith.constant 0 : index
    %c0_27 = arith.constant 0 : index
    %53 = vector.load %arg8[%c0_26, %c0_27] : memref<128x128xbf16, #tpu.memory_space<vmem>>, vector<128x128xbf16>
    %cst_28 = arith.constant dense<0.000000e+00> : vector<8x128xf32>
    %54 = tpu.matmul %52, %53, %cst_28 {dimension_numbers = #tpu.dot_dimension_numbers<[1], [0], [0], [1], [0, 0, 1, 1], [], []>} : vector<8x128xbf16>, vector<128x128xbf16>, vector<8x128xf32> -> vector<8x128xf32>
    %c0_29 = arith.constant 0 : index
    %c0_30 = arith.constant 0 : index
    %55 = vector.load %arg9[%c0_29, %c0_30] : memref<1x128xf32, #tpu.memory_space<vmem>>, vector<1x128xf32>
    %c0_31 = arith.constant 0 : index
    %c0_32 = arith.constant 0 : index
    %56 = vector.load %arg10[%c0_31, %c0_32] : memref<1x128xf32, #tpu.memory_space<vmem>>, vector<1x128xf32>
    %cst_33 = arith.constant dense<0.000000e+00> : vector<128xf32>
    %57 = vector.multi_reduction <add>, %54, %cst_33 [0] : vector<8x128xf32> to vector<128xf32>
    %58 = vector.shape_cast %57 : vector<128xf32> to vector<1x128xf32>
    %cst_34 = arith.constant 8.000000e+00 : f32
    %59 = vector.broadcast %cst_34 : f32 to vector<1x128xf32>
    %60 = arith.divf %58, %59 : vector<1x128xf32>
    %61 = vector.broadcast %60 : vector<1x128xf32> to vector<8x128xf32>
    %62 = arith.subf %54, %61 : vector<8x128xf32>
    %63 = arith.mulf %62, %62 : vector<8x128xf32>
    %cst_35 = arith.constant dense<0.000000e+00> : vector<128xf32>
    %64 = vector.multi_reduction <add>, %63, %cst_35 [0] : vector<8x128xf32> to vector<128xf32>
    %65 = vector.shape_cast %64 : vector<128xf32> to vector<1x128xf32>
    %cst_36 = arith.constant 8.000000e+00 : f32
    %66 = vector.broadcast %cst_36 : f32 to vector<1x128xf32>
    %67 = arith.divf %65, %66 : vector<1x128xf32>
    %cst_37 = arith.constant 9.99999974E-6 : f32
    %68 = vector.broadcast %cst_37 : f32 to vector<1x128xf32>
    %69 = arith.addf %67, %68 : vector<1x128xf32>
    %70 = math.rsqrt %69 : vector<1x128xf32>
    %71 = arith.mulf %55, %70 : vector<1x128xf32>
    %72 = vector.broadcast %71 : vector<1x128xf32> to vector<8x128xf32>
    %73 = arith.mulf %62, %72 : vector<8x128xf32>
    %74 = vector.broadcast %56 : vector<1x128xf32> to vector<8x128xf32>
    %75 = arith.addf %73, %74 : vector<8x128xf32>
    %c0_38 = arith.constant 0 : index
    %c0_39 = arith.constant 0 : index
    %76 = vector.load %arg11[%c0_38, %c0_39] : memref<8x128xf32, #tpu.memory_space<vmem>>, vector<8x128xf32>
    tpu.vector_store %arg11[%c0_38, %c0_39], %75 {strides = array<i32>} : memref<8x128xf32, #tpu.memory_space<vmem>>, vector<8x128xf32>,
    return
  }
  func.func @transform_0(%arg0: i32) -> (i32, i32) {
    %c0_i32 = arith.constant 0 : i32
    %c0_i32_0 = arith.constant 0 : i32
    %c0_i32_1 = arith.constant 0 : i32
    return %c0_i32, %c0_i32_0 : i32, i32
  }
  func.func @transform_1(%arg0: i32) -> (i32, i32) {
    %c0_i32 = arith.constant 0 : i32
    %c0_i32_0 = arith.constant 0 : i32
    %c0_i32_1 = arith.constant 0 : i32
    return %c0_i32, %c0_i32_0 : i32, i32
  }
  func.func @transform_2(%arg0: i32) -> (i32, i32) {
    %c0_i32 = arith.constant 0 : i32
    %c0_i32_0 = arith.constant 0 : i32
    %c0_i32_1 = arith.constant 0 : i32
    return %c0_i32, %c0_i32_0 : i32, i32
  }
  func.func @transform_3(%arg0: i32) -> (i32, i32) {
    %c0_i32 = arith.constant 0 : i32
    %c0_i32_0 = arith.constant 0 : i32
    %c0_i32_1 = arith.constant 0 : i32
    return %c0_i32, %c0_i32_0 : i32, i32
  }
  func.func @transform_4(%arg0: i32) -> (i32, i32) {
    %c0_i32 = arith.constant 0 : i32
    %c0_i32_0 = arith.constant 0 : i32
    %c0_i32_1 = arith.constant 0 : i32
    return %c0_i32, %c0_i32_0 : i32, i32
  }
  func.func @transform_5(%arg0: i32) -> (i32, i32) {
    %c0_i32 = arith.constant 0 : i32
    %c0_i32_0 = arith.constant 0 : i32
    %c0_i32_1 = arith.constant 0 : i32
    return %c0_i32, %c0_i32_0 : i32, i32
  }
  func.func @transform_6(%arg0: i32) -> (i32, i32) {
    %c0_i32 = arith.constant 0 : i32
    %c0_i32_0 = arith.constant 0 : i32
    %c0_i32_1 = arith.constant 0 : i32
    return %c0_i32, %c0_i32_0 : i32, i32
  }
  func.func @transform_7(%arg0: i32) -> (i32, i32) {
    %c0_i32 = arith.constant 0 : i32
    %c0_i32_0 = arith.constant 0 : i32
    %c0_i32_1 = arith.constant 0 : i32
    return %c0_i32, %c0_i32_0 : i32, i32
  }
  func.func @transform_8(%arg0: i32) -> (i32, i32) {
    %c0_i32 = arith.constant 0 : i32
    %c0_i32_0 = arith.constant 0 : i32
    %c0_i32_1 = arith.constant 0 : i32
    return %c0_i32, %c0_i32_0 : i32, i32
  }
  func.func @transform_9(%arg0: i32) -> (i32, i32) {
    %c0_i32 = arith.constant 0 : i32
    %c0_i32_0 = arith.constant 0 : i32
    %c0_i32_1 = arith.constant 0 : i32
    return %c0_i32, %c0_i32_0 : i32, i32
  }
  func.func @transform_10(%arg0: i32) -> (i32, i32) {
    %c0_i32 = arith.constant 0 : i32
    %c0_i32_0 = arith.constant 0 : i32
    %c0_i32_1 = arith.constant 0 : i32
    return %c0_i32, %c0_i32_0 : i32, i32
  }
}

</mosaic_0001>

<bundles_post_ra>
// kernel: projection_mlp_forward.1
= control target key start
LH: loop header
LB: loop body
LE: loop exit
PB: predicated region body
PF: predicated region fallthrough
CT: control target
= control target key end

     0   :  { %s1784_s0 = inlined_call_operand.vmem [shape: bf16[8,1024], index: 0, kind: input, shape index: {}]   ;;  %s1785_s1 = inlined_call_operand.vmem [shape: bf16[1024,128], index: 1, kind: input, shape index: {}]   ;;  %s1786_s2 = inlined_call_operand.vmem [shape: f32[1,128], index: 2, kind: input, shape index: {}]   ;;  %s1787_s3 = inlined_call_operand.vmem [shape: f32[1,128], index: 3, kind: input, shape index: {}]   ;;  %s1788_s4 = inlined_call_operand.vmem [shape: bf16[128,128], index: 4, kind: input, shape index: {}]   ;;  %s1789_s5 = inlined_call_operand.vmem [shape: f32[1,128], index: 5, kind: input, shape index: {}]   ;;  %s1790_s6 = inlined_call_operand.vmem [shape: f32[1,128], index: 6, kind: input, shape index: {}]   ;;  %s1791_s7 = inlined_call_operand.vmem [shape: bf16[128,128], index: 7, kind: input, shape index: {}]   ;;  %s1792_s8 = inlined_call_operand.vmem [shape: f32[1,128], index: 8, kind: input, shape index: {}]   ;;  %s1793_s9 = inlined_call_operand.vmem [shape: f32[1,128], index: 9, kind: input, shape index: {}]   ;;  %s1794_s10 = inlined_call_operand.hbm [shape: f32[8,128], index: 10, kind: output, shape index: {}]  }
   0x1   :  { %v1314_v0 = vld [vmem:[%s1785_s1 + $0x78] sm:$0xff]   ;;  %v1318_v4 = vld [vmem:[%s1785_s1 + $0x70] sm:$0xff]   ;;  %v1322_v8 = vld [vmem:[%s1785_s1 + $0x68] sm:$0xff]  }
   0x2   :  { %v1315_v1 = vld [vmem:[%s1785_s1 + $0xf8] sm:$0xff]   ;;  %1165 = vmatprep.subr.bf16.mxu0 %v1314_v0  ;;  %v1319_v5 = vld [vmem:[%s1785_s1 + $0xf0] sm:$0xff]   ;;  %v1323_v9 = vld [vmem:[%s1785_s1 + $0xe8] sm:$0xff]  }
   0x3   :  { %v1316_v2 = vld [vmem:[%s1785_s1 + $0x38] sm:$0xff]   ;;  %1187 = vmatprep.subr.bf16.mxu1 %v1315_v1  ;;  %v1320_v6 = vld [vmem:[%s1785_s1 + $0x30] sm:$0xff]   ;;  %v1324_v10 = vld [vmem:[%s1785_s1 + $0x28] sm:$0xff]  }
   0x4   :  { %v1317_v3 = vld [vmem:[%s1785_s1 + $0xb8] sm:$0xff]   ;;  %1166 = vmatpush3.bf16.msra.mxu0 %v1316_v2  ;;  %v1321_v7 = vld [vmem:[%s1785_s1 + $0xb0] sm:$0xff]   ;;  %v1325_v11 = vld [vmem:[%s1785_s1 + $0xa8] sm:$0xff]  }
   0x5   :  { %1188 = vmatpush3.bf16.msra.mxu1 %v1317_v3  ;;  %1167 = vmatprep.subr.bf16.mxu0 %v1318_v4  ;;  %v1326_v12 = vld [vmem:[%s1785_s1 + $0x60] sm:$0xff]   ;;  %v1330_v16 = vld [vmem:[%s1785_s1 + $0x58] sm:$0xff]   ;;  %v1334_v20 = vld [vmem:[%s1785_s1 + $0x50] sm:$0xff]  }
   0x6   :  { %1189 = vmatprep.subr.bf16.mxu1 %v1319_v5  ;;  %v1327_v13 = vld [vmem:[%s1785_s1 + $0xe0] sm:$0xff]   ;;  %v1331_v17 = vld [vmem:[%s1785_s1 + $0xd8] sm:$0xff]   ;;  %v1335_v21 = vld [vmem:[%s1785_s1 + $0xd0] sm:$0xff]  }
   0x7   :  { %v1328_v14 = vld [vmem:[%s1785_s1 + $0x20] sm:$0xff]   ;;  %v1332_v18 = vld [vmem:[%s1785_s1 + $0x18] sm:$0xff]   ;;  %v1336_v22 = vld [vmem:[%s1785_s1 + $0x10] sm:$0xff]  }
   0x8   :  { %1168 = vmatpush3.bf16.msra.mxu0 %v1320_v6  ;;  %v1329_v15 = vld [vmem:[%s1785_s1 + $0xa0] sm:$0xff]   ;;  %v1333_v19 = vld [vmem:[%s1785_s1 + $0x98] sm:$0xff]   ;;  %v1337_v23 = vld [vmem:[%s1785_s1 + $0x90] sm:$0xff]  }
   0x9   :  { %1190 = vmatpush3.bf16.msra.mxu1 %v1321_v7  ;;  %1169 = vmatprep.subr.bf16.mxu0 %v1322_v8  ;;  %v1338_v24 = vld [vmem:[%s1785_s1 + $0x48] sm:$0xff]   ;;  %v1342_v28 = vld [vmem:[%s1785_s1 + $0x40] sm:$0xff]   ;;  %v1350_v38 = vld [vmem:[%s1785_s1 + $0x178] sm:$0xff]  }
   0xa   :  { %1191 = vmatprep.subr.bf16.mxu1 %v1323_v9  ;;  %v1339_v25 = vld [vmem:[%s1785_s1 + $0xc8] sm:$0xff]   ;;  %v1343_v29 = vld [vmem:[%s1785_s1 + $0xc0] sm:$0xff]   ;;  %v1351_v39 = vld [vmem:[%s1785_s1 + $0x1f8] sm:$0xff]  }
   0xb   :  { %v1340_v26 = vld [vmem:[%s1785_s1 + $0x8] sm:$0xff]   ;;  %v1344_v30 = vld [vmem:[%s1785_s1] sm:$0xff]   ;;  %v1352_v40 = vld [vmem:[%s1785_s1 + $0x138] sm:$0xff]  }
   0xc   :  { %1170 = vmatpush3.bf16.msra.mxu0 %v1324_v10  ;;  %v1341_v27 = vld [vmem:[%s1785_s1 + $0x88] sm:$0xff]   ;;  %v1345_v31 = vld [vmem:[%s1785_s1 + $0x80] sm:$0xff]   ;;  %v1353_v41 = vld [vmem:[%s1785_s1 + $0x1b8] sm:$0xff]  }
   0xd   :  { %1192 = vmatpush3.bf16.msra.mxu1 %v1325_v11  ;;  %1171 = vmatprep.subr.bf16.mxu0 %v1326_v12  ;;  %v37_v32 = vld [vmem:[%s1784_s0] sm:$0xff]  ;;  %v38_v33 = vld [vmem:[%s1784_s0 + $0x8] sm:$0xff]  ;;  %v1354_v42 = vld [vmem:[%s1785_s1 + $0x170] sm:$0xff]  }
   0xe   :  { %1193 = vmatprep.subr.bf16.mxu1 %v1327_v13  ;;  %v1074_v34 = vcombine.low %v37_v32, %v37_v32  ;;  %v1075_v35 = vcombine.high %v37_v32, %v37_v32  ;;  %v1076_v36 = vcombine.low %v38_v33, %v38_v33  ;;  %v1077_v37 = vcombine.high %v38_v33, %v38_v33  ;;  %v1355_v43 = vld [vmem:[%s1785_s1 + $0x1f0] sm:$0xff]   ;;  %v1358_v46 = vld [vmem:[%s1785_s1 + $0x168] sm:$0xff]   ;;  %v1362_v50 = vld [vmem:[%s1785_s1 + $0x160] sm:$0xff]  }
   0xf   :  { %v1356_v44 = vld [vmem:[%s1785_s1 + $0x130] sm:$0xff]   ;;  %v1359_v47 = vld [vmem:[%s1785_s1 + $0x1e8] sm:$0xff]   ;;  %v1363_v51 = vld [vmem:[%s1785_s1 + $0x1e0] sm:$0xff]  }
  0x10   :  { %1172 = vmatpush3.bf16.msra.mxu0 %v1328_v14  ;;  %613 = vmatprep.mubr.bf16.mxu0 %v1075_v35  ;;  %v1357_v45 = vld [vmem:[%s1785_s1 + $0x1b0] sm:$0xff]   ;;  %v1360_v48 = vld [vmem:[%s1785_s1 + $0x128] sm:$0xff]   ;;  %v1364_v52 = vld [vmem:[%s1785_s1 + $0x120] sm:$0xff]  }
  0x11   :  { %1194 = vmatpush3.bf16.msra.mxu1 %v1329_v15  ;;  %1173 = vmatprep.subr.bf16.mxu0 %v1330_v16  ;;  %v1361_v49 = vld [vmem:[%s1785_s1 + $0x1a8] sm:$0xff]   ;;  %v1365_v53 = vld [vmem:[%s1785_s1 + $0x1a0] sm:$0xff]   ;;  %v1366_v54 = vld [vmem:[%s1785_s1 + $0x158] sm:$0xff]  }
  0x12   :  { %1195 = vmatprep.subr.bf16.mxu1 %v1331_v17  ;;  %653 = vmatprep.mubr.bf16.mxu1 %v1077_v37  ;;  %v1367_v55 = vld [vmem:[%s1785_s1 + $0x1d8] sm:$0xff]   ;;  %v1370_v58 = vld [vmem:[%s1785_s1 + $0x150] sm:$0xff]   ;;  %v1374_v62 = vld [vmem:[%s1785_s1 + $0x148] sm:$0xff]  }
  0x13   :  { %v1368_v56 = vld [vmem:[%s1785_s1 + $0x118] sm:$0xff]   ;;  %v1371_v59 = vld [vmem:[%s1785_s1 + $0x1d0] sm:$0xff]   ;;  %v1375_v63 = vld [vmem:[%s1785_s1 + $0x1c8] sm:$0xff]  }
  0x14   :  { %1174 = vmatpush3.bf16.msra.mxu0 %v1332_v18  ;;  %v1369_v57 = vld [vmem:[%s1785_s1 + $0x198] sm:$0xff]   ;;  %v1372_v60 = vld [vmem:[%s1785_s1 + $0x110] sm:$0xff]   ;;  %v1376_v0 = vld [vmem:[%s1785_s1 + $0x108] sm:$0xff]  }
  0x15   :  { %1196 = vmatpush3.bf16.msra.mxu1 %v1333_v19  ;;  %1175 = vmatprep.subr.bf16.mxu0 %v1334_v20  ;;  %v1373_v61 = vld [vmem:[%s1785_s1 + $0x190] sm:$0xff]   ;;  %v1377_v1 = vld [vmem:[%s1785_s1 + $0x188] sm:$0xff]   ;;  %v1378_v2 = vld [vmem:[%s1785_s1 + $0x140] sm:$0xff]  }
  0x16   :  { %1197 = vmatprep.subr.bf16.mxu1 %v1335_v21  ;;  %v1379_v3 = vld [vmem:[%s1785_s1 + $0x1c0] sm:$0xff]   ;;  %v39_v6 = vld [vmem:[%s1784_s0 + $0x10] sm:$0xff]  ;;  %v40_v9 = vld [vmem:[%s1784_s0 + $0x18] sm:$0xff] }
  0x17   :  { %v1380_v4 = vld [vmem:[%s1785_s1 + $0x100] sm:$0xff]   ;;  %v1078_v7 = vcombine.low %v39_v6, %v39_v6  ;;  %v1079_v8 = vcombine.high %v39_v6, %v39_v6  ;;  %v1080_v10 = vcombine.low %v40_v9, %v40_v9  ;;  %v1081_v11 = vcombine.high %v40_v9, %v40_v9 }
  0x18   :  { %1176 = vmatpush3.bf16.msra.mxu0 %v1336_v22  ;;  %v1381_v5 = vld [vmem:[%s1785_s1 + $0x180] sm:$0xff]  }
  0x19   :  { %1198 = vmatpush3.bf16.msra.mxu1 %v1337_v23  ;;  %1177 = vmatprep.subr.bf16.mxu0 %v1338_v24 }
  0x1a   :  { %1199 = vmatprep.subr.bf16.mxu1 %v1339_v25 }
  0x1c   :  { %1178 = vmatpush3.bf16.msra.mxu0 %v1340_v26 }
  0x1d   :  { %1200 = vmatpush3.bf16.msra.mxu1 %v1341_v27  ;;  %1179 = vmatprep.subr.bf16.mxu0 %v1342_v28 }
  0x1e   :  { %1201 = vmatprep.subr.bf16.mxu1 %v1343_v29 }
  0x20   :  { %1180 = vmatpush3.bf16.msra.mxu0 %v1344_v30 }
  0x21   :  { %1202 = vmatpush3.bf16.msra.mxu1 %v1345_v31  ;;  %1209 = vmatprep.subr.bf16.mxu0 %v1350_v38 }
  0x22   :  { %1231 = vmatprep.subr.bf16.mxu1 %v1351_v39 }
  0x23   :  { %614 = vmatmul.mubr.bf16.vlgmr.msra.gmra.mxu0 %v1074_v34 }
  0x24   :  { %654 = vmatmul.mubr.bf16.vlgmr.msra.gmra.mxu1 %v1076_v36  ;;  %1210 = vmatpush3.bf16.msra.mxu0 %v1352_v40 }
  0x25   :  { %1232 = vmatpush3.bf16.msra.mxu1 %v1353_v41  ;;  %1211 = vmatprep.subr.bf16.mxu0 %v1354_v42 }
  0x26   :  { %1233 = vmatprep.subr.bf16.mxu1 %v1355_v43  ;;  %693 = vmatprep.mubr.bf16.mxu0 %v1079_v8 }
  0x27   :  { %733 = vmatprep.mubr.bf16.mxu1 %v1081_v11 }
  0x28   :  { %1212 = vmatpush3.bf16.msra.mxu0 %v1356_v44 }
  0x29   :  { %1234 = vmatpush3.bf16.msra.mxu1 %v1357_v45  ;;  %1213 = vmatprep.subr.bf16.mxu0 %v1358_v46 }
  0x2a   :  { %1235 = vmatprep.subr.bf16.mxu1 %v1359_v47 }
  0x2c   :  { %1214 = vmatpush3.bf16.msra.mxu0 %v1360_v48 }
  0x2d   :  { %1236 = vmatpush3.bf16.msra.mxu1 %v1361_v49  ;;  %1215 = vmatprep.subr.bf16.mxu0 %v1362_v50 }
  0x2e   :  { %1237 = vmatprep.subr.bf16.mxu1 %v1363_v51 }
  0x30   :  { %1216 = vmatpush3.bf16.msra.mxu0 %v1364_v52 }
  0x31   :  { %1238 = vmatpush3.bf16.msra.mxu1 %v1365_v53  ;;  %1217 = vmatprep.subr.bf16.mxu0 %v1366_v54 }
  0x32   :  { %1239 = vmatprep.subr.bf16.mxu1 %v1367_v55 }
  0x34   :  { %1218 = vmatpush3.bf16.msra.mxu0 %v1368_v56 }
  0x35   :  { %1240 = vmatpush3.bf16.msra.mxu1 %v1369_v57  ;;  %1219 = vmatprep.subr.bf16.mxu0 %v1370_v58 }
  0x36   :  { %1241 = vmatprep.subr.bf16.mxu1 %v1371_v59 }
  0x38   :  { %1220 = vmatpush3.bf16.msra.mxu0 %v1372_v60 }
  0x39   :  { %1242 = vmatpush3.bf16.msra.mxu1 %v1373_v61  ;;  %1221 = vmatprep.subr.bf16.mxu0 %v1374_v62 }
  0x3a   :  { %1243 = vmatprep.subr.bf16.mxu1 %v1375_v63 }
  0x3c   :  { %1222 = vmatpush3.bf16.msra.mxu0 %v1376_v0 }
  0x3d   :  { %1244 = vmatpush3.bf16.msra.mxu1 %v1377_v1  ;;  %1223 = vmatprep.subr.bf16.mxu0 %v1378_v2 }
  0x3e   :  { %1245 = vmatprep.subr.bf16.mxu1 %v1379_v3 }
  0x40   :  { %1224 = vmatpush3.bf16.msra.mxu0 %v1380_v4 }
  0x41   :  { %1246 = vmatpush3.bf16.msra.mxu1 %v1381_v5 }
  0x43   :  { %694 = vmatmul.mubr.bf16.vlgmr.msra.gmra.mxu0 %v1078_v7 }
  0x44   :  { %734 = vmatmul.mubr.bf16.vlgmr.msra.gmra.mxu1 %v1080_v10 }
  0x45   :  { %15 = vsyncpa [#allocation3], 0  ;;  %v1386_v12 = vld [vmem:[%s1788_s4 + $0x38] sm:$0xff]   ;;  %v1430_v13 = vmov 0.0   ;;  %v1387_v14 = vld [vmem:[%s1788_s4 + $0x30] sm:$0xff]   ;;  %vm1431_vm0 = vmmov 0   ;;  %v764_v61 = vlaneseq }
  0x46   :  { %1271 = vmatprep.subr.bf16.mxu0 %v1430_v13  ;;  %1291 = vmatprep.subr.bf16.mxu1 %v1430_v13  ;;  %v1388_v15 = vld [vmem:[%s1788_s4 + $0x28] sm:$0xff]   ;;  %v1389_v16 = vld [vmem:[%s1788_s4 + $0x20] sm:$0xff]   ;;  %v1390_v17 = vld [vmem:[%s1788_s4 + $0x18] sm:$0xff]  }
  0x47   :  { %1272 = vmatpush3.bf16.msra.mxu0 %v1386_v12  ;;  %v1391_v18 = vld [vmem:[%s1788_s4 + $0x10] sm:$0xff]   ;;  %v1392_v19 = vld [vmem:[%s1788_s4 + $0x8] sm:$0xff]   ;;  %v1393_v20 = vld [vmem:[%s1788_s4] sm:$0xff]   ;;  %1287 = vmatprep.mubr.msk.bf16.mxu0 %vm1431_vm0, %v1430_v13  ;;  %v765_v62 = vshrl.u32 %v764_v61, 7  ;;  %s1432_s4 = smov [#allocation2]  }
  0x48   :  { %1273 = vmatprep.subr.bf16.mxu0 %v1430_v13  ;;  %1307 = vmatprep.mubr.msk.bf16.mxu1 %vm1431_vm0, %v1430_v13  ;;  %v741_v63 = vld [vmem:[%s1786_s2] sm:$0x1]  ;;  %v1394_v9 = vld [vmem:[%s1791_s7 + $0x38] sm:$0xff]   ;;  %v1395_v10 = vld [vmem:[%s1791_s7 + $0x30] sm:$0xff]   ;;  %s1066_s23 = sshll.u32 %s1432_s4, 4  ;;  %s1067_s23 = int_to_ptr.vmem [resolvable:$true] %s1066_s23 }
  0x49   :  { %v1730_v0 = vsub.s32 0, %v765_v62  ;;  %v1146_v4 = vld [vmem:[%s1787_s3] ss:$0 sm:$0xff]  ;;  %1292 = vmatpush3.bf16.msra.mxu1 %v1394_v9  ;;  %v1396_v11 = vld [vmem:[%s1791_s7 + $0x28] sm:$0xff]   ;;  %s1408_s24 = scalar_lea.vmem %s1067_s23, 128  ;;  %p1413_p1 = scmp.lt.s32.totalorder %s1067_s23, %s1067_s23 }
  0x4a   :  { %1293 = vmatprep.subr.bf16.mxu1 %v1430_v13  ;;  %v1397_v12 = vld [vmem:[%s1791_s7 + $0x20] sm:$0xff]   ;;  %p1409_p0 = scmp.ne.s32.totalorder %s1067_s23, %s1408_s24  ;;  %p1414_p2 = scmp.lt.s32.totalorder %s1408_s24, %s1408_s24 }
  0x4b   :  { %1274 = vmatpush3.bf16.msra.mxu0 %v1387_v14  ;;  %v1398_v14 = vld [vmem:[%s1791_s7 + $0x18] sm:$0xff]   ;;  %v1164_v9 = vld [vmem:[%s1793_s9] ss:$0 sm:$0xff] }
  0x4c   :  { %1275 = vmatprep.subr.bf16.mxu0 %v1430_v13  ;;  %p1415_p3 = por %p1414_p2, %p1413_p1 }
  0x4d   :  { %1294 = vmatpush3.bf16.msra.mxu1 %v1395_v10 }
  0x4e   :  { %1295 = vmatprep.subr.bf16.mxu1 %v1430_v13  ;;  %p1416_p4 = pnand %p1415_p3, %p1409_p0 }
  0x4f   :  { %1276 = vmatpush3.bf16.msra.mxu0 %v1388_v15  ;;  %v1399_v15 = vld [vmem:[%s1791_s7 + $0x10] sm:$0xff]  }
  0x50   :  { %1277 = vmatprep.subr.bf16.mxu0 %v1430_v13 }
  0x51   :  { %1296 = vmatpush3.bf16.msra.mxu1 %v1396_v11 }
  0x52   :  { %1297 = vmatprep.subr.bf16.mxu1 %v1430_v13 }
  0x53   :  { %1278 = vmatpush3.bf16.msra.mxu0 %v1389_v16  ;;  %v1400_v16 = vld [vmem:[%s1791_s7 + $0x8] sm:$0xff]  }
  0x54   :  { %1279 = vmatprep.subr.bf16.mxu0 %v1430_v13 }
  0x55   :  { %1298 = vmatpush3.bf16.msra.mxu1 %v1397_v12 }
  0x56   :  { %1299 = vmatprep.subr.bf16.mxu1 %v1430_v13 }
  0x57   :  { %1280 = vmatpush3.bf16.msra.mxu0 %v1390_v17  ;;  %v1401_v17 = vld [vmem:[%s1791_s7] sm:$0xff]  }
  0x58   :  { %1281 = vmatprep.subr.bf16.mxu0 %v1430_v13 }
  0x59   :  { %1300 = vmatpush3.bf16.msra.mxu1 %v1398_v14 }
  0x5a   :  { %1301 = vmatprep.subr.bf16.mxu1 %v1430_v13 }
  0x5b   :  { %1282 = vmatpush3.bf16.msra.mxu0 %v1391_v18 }
  0x5c   :  { %1283 = vmatprep.subr.bf16.mxu0 %v1430_v13 }
  0x5d   :  { %1302 = vmatpush3.bf16.msra.mxu1 %v1399_v15 }
  0x5e   :  { %1303 = vmatprep.subr.bf16.mxu1 %v1430_v13 }
  0x5f   :  { %1284 = vmatpush3.bf16.msra.mxu0 %v1392_v19 }
  0x60   :  { %1285 = vmatprep.subr.bf16.mxu0 %v1430_v13 }
  0x61   :  { %1304 = vmatpush3.bf16.msra.mxu1 %v1400_v16 }
  0x62   :  { %1305 = vmatprep.subr.bf16.mxu1 %v1430_v13 }
  0x63   :  { %1286 = vmatpush3.bf16.msra.mxu0 %v1393_v20 }
  0x65   :  { %1306 = vmatpush3.bf16.msra.mxu1 %v1401_v17 }
  0xe3   :  { %v1181_v21 = vpop.f32.mrf.mxu0 }
  0xe4   :  { %v1203_v22 = vpop.f32.mrf.mxu1 }
  0xe5   :  { %v1182_v23 = vpop.f32.mrf.mxu0 }
  0xe6   :  { %v1204_v24 = vpop.f32.mrf.mxu1  ;;  %v1183_v29 = vadd.f32 %v1182_v23, %v1181_v21 }
  0xe7   :  { %v1184_v25 = vpop.f32.mrf.mxu0  ;;  %v1205_v30 = vadd.f32 %v1204_v24, %v1203_v22 }
  0xe8   :  { %v1206_v26 = vpop.f32.mrf.mxu1 }
  0xe9   :  { %v1185_v27 = vpop.f32.mrf.mxu0  ;;  %v656_v35 = vadd.f32 %v1205_v30, %v1183_v29 }
  0xea   :  { %v1207_v28 = vpop.f32.mrf.mxu1 }
 0x103   :  { %v1225_v31 = vpop.f32.mrf.mxu0 }
 0x104   :  { %v1247_v32 = vpop.f32.mrf.mxu1 }
 0x105   :  { %v1226_v33 = vpop.f32.mrf.mxu0 }
 0x106   :  { %v1248_v34 = vpop.f32.mrf.mxu1  ;;  %v1227_v36 = vadd.f32 %v1226_v33, %v1225_v31 }
 0x107   :  { %v1228_v37 = vpop.f32.mrf.mxu0  ;;  %v1249_v40 = vadd.f32 %v1248_v34, %v1247_v32 }
 0x108   :  { %v1250_v38 = vpop.f32.mrf.mxu1  ;;  %v696_v39 = vadd.f32 %v1227_v36, %v656_v35 }
 0x109   :  { %v1229_v41 = vpop.f32.mrf.mxu0  ;;  %v883_v38 = vld [vmem:[%s1789_s5] sm:$0x1] }
 0x10a   :  { %v1251_v42 = vpop.f32.mrf.mxu1  ;;  %v736_v43 = vadd.f32 %v1249_v40, %v696_v39 }
 0x10b   :  { %v1155_v42 = vld [vmem:[%s1790_s6] ss:$0 sm:$0xff] }
 0x10c   :  { %v743_v44 = vrot.slane %v736_v43, 4 }
 0x10e   :  { %v744_v45 = vadd.f32 %v743_v44, %v736_v43 }
 0x110   :  { %v745_v46 = vrot.slane %v744_v45, 2 }
 0x112   :  { %v746_v47 = vadd.f32 %v745_v46, %v744_v45 }
 0x114   :  { %v747_v48 = vrot.slane %v746_v47, 1 }
 0x116   :  { %v748_v49 = vadd.f32 %v747_v48, %v746_v47 }
 0x118   :  { %v750_v50 = vmul.f32 0.125, %v748_v49 }
 0x11a   :  { %v751_v51 = vsub.f32 %v736_v43, %v750_v50 }
 0x11c   :  { %v752_v52 = vmul.f32 %v751_v51, %v751_v51 }
 0x11e   :  { %v753_v53 = vrot.slane %v752_v52, 4 }
 0x120   :  { %v754_v54 = vadd.f32 %v753_v53, %v752_v52 }
 0x122   :  { %v755_v55 = vrot.slane %v754_v54, 2 }
 0x124   :  { %v756_v56 = vadd.f32 %v755_v55, %v754_v54 }
 0x126   :  { %v757_v57 = vrot.slane %v756_v56, 1 }
 0x128   :  { %v758_v58 = vadd.f32 %v757_v57, %v756_v56 }
 0x12a   :  { %v759_v59 = vmul.f32 0.125, %v758_v58 }
 0x12c   :  { %v760_v60 = vadd.f32 1e-05, %v759_v59 }
 0x12e   :  { %1402 = vrsqrt.f32 %v760_v60 }
 0x13b   :  { %v1403_v1 = vpop.eup %1402 }
 0x13c   :  { %v762_v2 = vmul.f32 %v1403_v1, %v741_v63 }
 0x13e   :  { %v767_v3 = vrot.slane %v762_v2, %v1730_v0 }
 0x140   :  { %v769_v5 = vmul.f32 %v767_v3, %v751_v51 }
 0x142   :  { %v776_v6 = vadd.f32 %v1146_v4, %v769_v5  ;;  %v1024_v5 = vld [vmem:[%s1792_s8] sm:$0x1] }
 0x144   :  { %v777_v7 = vmax.f32 %v776_v6, 0.0 }
 0x146   :  { %v778_v8 = vpack.c.bf16 %v777_v7, %v777_v7 }
 0x148   :  { %1288 = vmatmul.mubr.bf16.vlgmr.msra.gmra.mxu0 %v778_v8 }
 0x208   :  { %v877_v18 = vpop.f32.mrf.mxu0 }
 0x209   :  { %v885_v19 = vrot.slane %v877_v18, 4 }
 0x20a   :  { %v1289_v20 = vpop.f32.mrf.mxu0 }
 0x20b   :  { %v886_v21 = vadd.f32 %v885_v19, %v877_v18 }
 0x20c   :  { %v880_v22 = vpop.f32.mrf.mxu0 }
 0x20d   :  { %v887_v23 = vrot.slane %v886_v21, 2 }
 0x20e   :  { %v1290_v24 = vpop.f32.mrf.mxu0 }
 0x20f   :  { %v888_v25 = vadd.f32 %v887_v23, %v886_v21 }
 0x211   :  { %v889_v26 = vrot.slane %v888_v25, 1 }
 0x213   :  { %v890_v27 = vadd.f32 %v889_v26, %v888_v25 }
 0x215   :  { %v891_v28 = vmul.f32 0.125, %v890_v27 }
 0x217   :  { %v892_v29 = vsub.f32 %v877_v18, %v891_v28 }
 0x219   :  { %v893_v30 = vmul.f32 %v892_v29, %v892_v29 }
 0x21b   :  { %v894_v31 = vrot.slane %v893_v30, 4 }
 0x21d   :  { %v895_v13 = vadd.f32 %v894_v31, %v893_v30 }
 0x21f   :  { %v896_v32 = vrot.slane %v895_v13, 2 }
 0x221   :  { %v897_v33 = vadd.f32 %v896_v32, %v895_v13 }
 0x223   :  { %v898_v34 = vrot.slane %v897_v33, 1 }
 0x225   :  { %v899_v35 = vadd.f32 %v898_v34, %v897_v33 }
 0x227   :  { %v900_v36 = vmul.f32 0.125, %v899_v35 }
 0x229   :  { %v901_v37 = vadd.f32 1e-05, %v900_v36 }
 0x22b   :  { %1404 = vrsqrt.f32 %v901_v37 }
 0x238   :  { %v1405_v39 = vpop.eup %1404 }
 0x239   :  { %v903_v40 = vmul.f32 %v1405_v39, %v883_v38 }
 0x23b   :  { %v908_v41 = vrot.slane %v903_v40, %v1730_v0 }
 0x23d   :  { %v910_v43 = vmul.f32 %v908_v41, %v892_v29 }
 0x23f   :  { %v917_v44 = vadd.f32 %v1155_v42, %v910_v43 }
 0x241   :  { %v918_v45 = vmax.f32 %v917_v44, 0.0 }
 0x243   :  { %v919_v46 = vpack.c.bf16 %v918_v45, %v918_v45 }
 0x245   :  { %1308 = vmatmul.mubr.bf16.vlgmr.msra.gmra.mxu1 %v919_v46 }
 0x305   :  { %v1018_v47 = vpop.f32.mrf.mxu1 }
 0x306   :  { %v1026_v48 = vrot.slane %v1018_v47, 4 }
 0x307   :  { %v1309_v49 = vpop.f32.mrf.mxu1 }
 0x308   :  { %v1027_v50 = vadd.f32 %v1026_v48, %v1018_v47 }
 0x309   :  { %v1021_v51 = vpop.f32.mrf.mxu1 }
 0x30a   :  { %v1028_v52 = vrot.slane %v1027_v50, 2 }
 0x30b   :  { %v1310_v53 = vpop.f32.mrf.mxu1 }
 0x30c   :  { %v1029_v54 = vadd.f32 %v1028_v52, %v1027_v50 }
 0x30e   :  { %v1030_v55 = vrot.slane %v1029_v54, 1 }
 0x310   :  { %v1031_v56 = vadd.f32 %v1030_v55, %v1029_v54 }
 0x312   :  { %v1032_v57 = vmul.f32 0.125, %v1031_v56 }
 0x314   :  { %v1033_v58 = vsub.f32 %v1018_v47, %v1032_v57 }
 0x316   :  { %v1034_v59 = vmul.f32 %v1033_v58, %v1033_v58 }
 0x318   :  { %v1035_v60 = vrot.slane %v1034_v59, 4 }
 0x31a   :  { %v1036_v61 = vadd.f32 %v1035_v60, %v1034_v59 }
 0x31c   :  { %v1037_v62 = vrot.slane %v1036_v61, 2 }
 0x31e   :  { %v1038_v63 = vadd.f32 %v1037_v62, %v1036_v61 }
 0x320   :  { %v1039_v1 = vrot.slane %v1038_v63, 1 }
 0x322   :  { %v1040_v2 = vadd.f32 %v1039_v1, %v1038_v63 }
 0x324   :  { %v1041_v3 = vmul.f32 0.125, %v1040_v2 }
 0x326   :  { %v1042_v4 = vadd.f32 1e-05, %v1041_v3 }
 0x328   :  { %1406 = vrsqrt.f32 %v1042_v4 }
 0x335   :  { %v1407_v6 = vpop.eup %1406 }
 0x336   :  { %v1044_v7 = vmul.f32 %v1407_v6, %v1024_v5 }
 0x338   :  { %v1049_v8 = vrot.slane %v1044_v7, %v1730_v0 }
 0x33a   :  { %v1051_v10 = vmul.f32 %v1049_v8, %v1033_v58 }
 0x33c   :  { %v1058_v11 = vadd.f32 %v1164_v9, %v1051_v10 }
 0x33e   :  { %1059 = vst [vmem:[#allocation2] sm:$0xff] %v1058_v11 }
 0x33f   :  { %1419 = shalt.err (!%p1416_p4)
}
 0x340   :  { %1069 = dma.vmem_to_hbm [thread:$0]  %s1067_s23, 128, %s1794_s10, [#allocation3]  }
 0x341   :  { %1428 = dma.done.wait [#allocation3], 128  }
 0x342   :  { %1429 = vsyncadd [#allocation3], 4294967168 }
 0x343   :  { %1073 = vsyncpa [#allocation3], 1 }

</bundles_post_ra>
